<compile_context>
chip_gen: v5e
topology: v5e:2x2
jax: 0.10.0
libtpu: 0.0.40
codegen_flags: <defaults>
</compile_context>

<pallas_src>
import functools

import jax
import jax.numpy as jnp
from jax import lax
from jax.experimental import pallas as pl
from jax.experimental.pallas import tpu as pltpu


def _round_up(x, m):
    return (x + m - 1) // m * m


# ---------------------------------------------------------------------------
# Kernels
# ---------------------------------------------------------------------------

def _highway_resident_kernel(x_ref, w_ref, b_ref, o_ref, *, num_layers):
    """Grid = (row_tiles,).  All layers run in-kernel; weights stay VMEM-resident.

    x_ref: (tile_m, S)      input rows
    w_ref: (L, S, 2S)       full weight stack [Wt | Wg], (in, out) layout
    b_ref: (L, 1, 2S) f32   full bias stack  [bt | bg]
    o_ref: (tile_m, S)      output rows
    """
    h = x_ref[...].astype(jnp.float32)
    s = h.shape[-1]
    wdt = w_ref.dtype

    def layer(l, h):
        # One fused MXU pass for transform + gate (same LHS, wider RHS).
        z = jnp.dot(h.astype(wdt), w_ref[l],
                    preferred_element_type=jnp.float32) + b_ref[l]
        t = jnp.maximum(z[:, :s], 0.0)                      # relu(transform)
        # sigmoid via EUP exp + EUP approximate reciprocal (VPU slots stay free)
        g = pl.reciprocal(1.0 + jnp.exp(-z[:, s:]), approx=True)
        return h + g * (t - h)                              # == g*t + (1-g)*h

    if num_layers <= 8:
        for l in range(num_layers):                         # trace-time unroll
            h = layer(l, h)
    else:
        h = lax.fori_loop(0, num_layers, layer, h)

    o_ref[...] = h.astype(o_ref.dtype)


def _highway_streamed_kernel(x_ref, w_ref, b_ref, o_ref, h_ref):
    """Fallback when the weight stack does not fit VMEM.  Grid = (row_tiles, L)."""
    layer = pl.program_id(1)

    @pl.when(layer == 0)
    def _():
        h_ref[...] = x_ref[...].astype(jnp.float32)

    h = h_ref[...]
    s = h.shape[-1]
    z = jnp.dot(h.astype(w_ref.dtype), w_ref[0],
                preferred_element_type=jnp.float32) + b_ref[0]
    t = jnp.maximum(z[:, :s], 0.0)
    g = pl.reciprocal(1.0 + jnp.exp(-z[:, s:]), approx=True)
    h_new = h + g * (t - h)
    h_ref[...] = h_new

    @pl.when(layer == pl.num_programs(1) - 1)
    def _():
        o_ref[...] = h_new.astype(o_ref.dtype)


# ---------------------------------------------------------------------------
# Wrapper
# ---------------------------------------------------------------------------

def _vmem_capacity_bytes():
    try:
        info = pltpu.get_tpu_info()
        cap = getattr(info, "vmem_capacity_bytes", None)
        if cap:
            return int(cap)
    except Exception:
        pass
    return 64 * 1024 * 1024   # conservative: v7x per-TensorCore VMEM


def highway_forward(x, params, *, tile_m=None, weight_dtype=None,
                    vmem_budget_frac=0.85):
    """Full Highway forward in a single fused Pallas kernel (inference dropout).

    x:      (N, S) activations
    params: list of (wt, bt, wg, bg); wt/wg are (S, S) already in (in, out)
            layout, bt/bg are (1, S).
    tile_m: rows per grid step (default 1024, auto-shrunk to fit VMEM).
    weight_dtype: matmul weight dtype; defaults to bfloat16 when x is float32
            (accumulation is always f32), otherwise x.dtype.
    """
    N, S = x.shape
    L = len(params)
    dtype = x.dtype
    if weight_dtype is None:
        weight_dtype = jnp.bfloat16 if dtype == jnp.float32 else dtype
    itm = jnp.dtype(dtype).itemsize
    wsz = jnp.dtype(weight_dtype).itemsize

    S_pad = _round_up(S, 128)            # lane-dense (unmasked vst)
    granule = max(8, 32 // itm)          # sublane granule: 8 f32 / 16 bf16 / 32 i8

    # ---- Generation-aware VMEM budget --------------------------------------
    vmem_cap = _vmem_capacity_bytes()
    vmem_budget = int(vmem_cap * vmem_budget_frac)

    w_stack_bytes = L * S_pad * 2 * S_pad * wsz + L * 2 * S_pad * 4
    # Resident path: full weight stack stays in VMEM (budget 2x for the pipeliner's
    # buffer pair even though the constant index_map means it is DMA'd only once).
    resident = 2 * w_stack_bytes <= vmem_budget // 2

    def est_vmem(tm):
        io = 4 * tm * S_pad * itm                      # x + out, double-buffered
        temps = (3 * tm * S_pad * 4                    # h / t / g (f32)
                 + tm * 2 * S_pad * 4                  # z (f32)
                 + tm * S_pad * wsz)                   # h cast fed to the MXU
        if resident:
            return io + temps + 2 * w_stack_bytes
        per_layer_w = S_pad * 2 * S_pad * wsz + 2 * S_pad * 4
        return io + temps + tm * S_pad * 4 + 2 * per_layer_w   # + h scratch

    # ---- Row tile size ------------------------------------------------------
    if tile_m is None:
        tile_m = 1024                                   # sweep 512-2048 if tuning
    tile_m = max(granule, _round_up(min(tile_m, _round_up(N, granule)), granule))
    # Keep >=2 row tiles when N allows so v7x's second TensorCore gets work.
    if tile_m >= N and N >= 2 * granule:
        tile_m = _round_up((N + 1) // 2, granule)
    while est_vmem(tile_m) > vmem_budget and tile_m > granule:
        tile_m = max(granule, _round_up(tile_m // 2, granule))

    N_pad = _round_up(N, tile_m)
    vmem_limit = int(min(max(2 * est_vmem(tile_m), 16 * 1024 * 1024), vmem_budget))

    # ---- Pack weights: (L, S_pad, 2*S_pad) = [Wt | Wg]; biases (L, 1, 2*S_pad)
    wt = jnp.stack([p[0] for p in params]).astype(weight_dtype)
    wg = jnp.stack([p[2] for p in params]).astype(weight_dtype)
    bt = jnp.stack([jnp.reshape(p[1], (1, S)) for p in params]).astype(jnp.float32)
    bg = jnp.stack([jnp.reshape(p[3], (1, S)) for p in params]).astype(jnp.float32)
    if S_pad != S:
        pad = S_pad - S
        wt = jnp.pad(wt, ((0, 0), (0, pad), (0, pad)))
        wg = jnp.pad(wg, ((0, 0), (0, pad), (0, pad)))
        bt = jnp.pad(bt, ((0, 0), (0, 0), (0, pad)))
        bg = jnp.pad(bg, ((0, 0), (0, 0), (0, pad)))
    w_cat = jnp.concatenate([wt, wg], axis=-1)          # (L, S_pad, 2*S_pad)
    b_cat = jnp.concatenate([bt, bg], axis=-1)          # (L, 1, 2*S_pad)

    if N_pad != N or S_pad != S:
        x_pad = jnp.pad(x, ((0, N_pad - N), (0, S_pad - S)))
    else:
        x_pad = x

    if resident:
        out = pl.pallas_call(
            functools.partial(_highway_resident_kernel, num_layers=L),
            out_shape=jax.ShapeDtypeStruct((N_pad, S_pad), dtype),
            grid_spec=pltpu.PrefetchScalarGridSpec(
                num_scalar_prefetch=0,
                grid=(N_pad // tile_m,),
                in_specs=[
                    pl.BlockSpec((tile_m, S_pad), lambda i: (i, 0)),
                    # Constant index_map -> weight stack is DMA'd once and stays
                    # VMEM-resident across all row tiles.
                    pl.BlockSpec((L, S_pad, 2 * S_pad), lambda i: (0, 0, 0)),
                    pl.BlockSpec((L, 1, 2 * S_pad), lambda i: (0, 0, 0)),
                ],
                out_specs=pl.BlockSpec((tile_m, S_pad), lambda i: (i, 0)),
            ),
            compiler_params=pltpu.CompilerParams(
                dimension_semantics=("parallel",),
                vmem_limit_bytes=vmem_limit,
            ),
        )(x_pad, w_cat, b_cat)
    else:
        out = pl.pallas_call(
            _highway_streamed_kernel,
            out_shape=jax.ShapeDtypeStruct((N_pad, S_pad), dtype),
            grid_spec=pltpu.PrefetchScalarGridSpec(
                num_scalar_prefetch=0,
                grid=(N_pad // tile_m, L),
                in_specs=[
                    pl.BlockSpec((tile_m, S_pad), lambda i, l: (i, 0)),
                    pl.BlockSpec((1, S_pad, 2 * S_pad), lambda i, l: (l, 0, 0)),
                    pl.BlockSpec((1, 1, 2 * S_pad), lambda i, l: (l, 0, 0)),
                ],
                out_specs=pl.BlockSpec((tile_m, S_pad), lambda i, l: (i, 0)),
                scratch_shapes=[pltpu.VMEM((tile_m, S_pad), jnp.float32)],
            ),
            compiler_params=pltpu.CompilerParams(
                dimension_semantics=("parallel", "arbitrary"),
                vmem_limit_bytes=vmem_limit,
            ),
        )(x_pad, w_cat, b_cat)

    if N_pad == N and S_pad == S:
        return out
    return out[:N, :S]


# ---------------------------------------------------------------------------
# Params / reference
# ---------------------------------------------------------------------------

def init_highway_params(key, size, num_layers):
    """Deterministic nn.Linear-style init (uniform(-1/sqrt(size), 1/sqrt(size)))."""
    params = []
    bound = 1.0 / jnp.sqrt(jnp.float32(size))
    for _ in range(num_layers):
        k1, k2, k3, k4, key = jax.random.split(key, 5)
        # PyTorch Linear weight is (out, in); build (out, in) then transpose to (in, out).
        wt = jax.random.uniform(k1, (size, size), jnp.float32, -bound, bound).T
        bt = jax.random.uniform(k2, (1, size), jnp.float32, -bound, bound)
        wg = jax.random.uniform(k3, (size, size), jnp.float32, -bound, bound).T
        bg = jax.random.uniform(k4, (1, size), jnp.float32, -bound, bound)
        params.append((wt, bt, wg, bg))
    return params


def highway_reference(x, params):
    """Pure-JAX reference mirroring the PyTorch forward (dropout = identity)."""
    out = x
    for (wt, bt, wg, bg) in params:
        t = jax.nn.relu(out @ wt + bt)
        g = jax.nn.sigmoid(out @ wg + bg)
        out = g * t + (1.0 - g) * out
    return out


if __name__ == "__main__":
    key = jax.random.PRNGKey(0)
    k_x1, k_p1, k_x2, k_p2 = jax.random.split(key, 4)

    # Case 1: tiny shapes, f32 weights (tight check; only the approx-reciprocal
    # gate differs from the pure-JAX reference).
    batch, size, num_layers = 8, 32, 2
    x1 = jax.random.normal(k_x1, (batch, size), jnp.float32)
    p1 = init_highway_params(k_p1, size, num_layers)
    out1 = jax.block_until_ready(
        highway_forward(x1, p1, weight_dtype=jnp.float32))
    ref1 = highway_reference(x1, p1)
    assert out1.shape == x1.shape and out1.dtype == x1.dtype
    assert jnp.allclose(out1, ref1, atol=1e-2, rtol=1e-2), "mismatch (f32 weights)"

    # Case 2: exercises feature/row padding, multiple row tiles, and the default
    # bf16 weight path (looser tolerance vs. the f32 reference).
    n2, s2, l2 = 200, 72, 3
    x2 = jax.random.normal(k_x2, (n2, s2), jnp.float32)
    p2 = init_highway_params(k_p2, s2, l2)
    out2 = jax.block_until_ready(highway_forward(x2, p2))
    ref2 = highway_reference(x2, p2)
    assert out2.shape == x2.shape and out2.dtype == x2.dtype
    assert jnp.allclose(out2, ref2, atol=7e-2, rtol=7e-2), "mismatch (bf16 weights)"

    print("KERNEL_OK")
</pallas_src>

<mosaic_0001>
module attributes {stable_mosaic.version = 11 : i64} {
  func.func @_highway_resident_kernel(%arg0: i32, %arg1: memref<8x128xf32, #tpu.memory_space<vmem>>, %arg2: memref<2x128x256xf32, #tpu.memory_space<vmem>>, %arg3: memref<2x1x256xf32, #tpu.memory_space<vmem>>, %arg4: memref<8x128xf32, #tpu.memory_space<vmem>>) attributes {dimension_semantics = [#tpu.dimension_semantics<parallel>], iteration_bounds = array<i64: 1>, scalar_prefetch = 0 : i64, scratch_operands = 0 : i64, tpu.core_type = #tpu.core_type<tc>, window_params = [{transform_indices = @transform_0, window_bounds = array<i64: 8, 128>}, {pipeline_mode = #tpu.pipeline_mode<synchronous>, transform_indices = @transform_1, window_bounds = array<i64: 2, 128, 256>}, {pipeline_mode = #tpu.pipeline_mode<synchronous>, transform_indices = @transform_2, window_bounds = array<i64: 2, 1, 256>}, {transform_indices = @transform_3, window_bounds = array<i64: 8, 128>}]} {
    %c0 = arith.constant 0 : index
    %c0_0 = arith.constant 0 : index
    %0 = vector.load %arg1[%c0, %c0_0] : memref<8x128xf32, #tpu.memory_space<vmem>>, vector<8x128xf32>
    %c0_1 = arith.constant 0 : index
    %c0_2 = arith.constant 0 : index
    %c0_3 = arith.constant 0 : index
    %1 = vector.load %arg2[%c0_1, %c0_2, %c0_3] : memref<2x128x256xf32, #tpu.memory_space<vmem>>, vector<1x128x256xf32>
    %2 = vector.shape_cast %1 : vector<1x128x256xf32> to vector<128x256xf32>
    %cst = arith.constant dense<0.000000e+00> : vector<8x256xf32>
    %3 = tpu.matmul %0, %2, %cst {dimension_numbers = #tpu.dot_dimension_numbers<[1], [0], [0], [1], [0, 0, 1, 1], [], []>} : vector<8x128xf32>, vector<128x256xf32>, vector<8x256xf32> -> vector<8x256xf32>
    %c0_4 = arith.constant 0 : index
    %c0_5 = arith.constant 0 : index
    %c0_6 = arith.constant 0 : index
    %4 = vector.load %arg3[%c0_4, %c0_5, %c0_6] : memref<2x1x256xf32, #tpu.memory_space<vmem>>, vector<1x1x256xf32>
    %5 = vector.shape_cast %4 : vector<1x1x256xf32> to vector<1x256xf32>
    %6 = vector.broadcast %5 : vector<1x256xf32> to vector<8x256xf32>
    %7 = arith.addf %3, %6 : vector<8x256xf32>
    %8 = vector.extract_strided_slice %7 {offsets = [0, 0], sizes = [8, 128], strides = [1, 1]} : vector<8x256xf32> to vector<8x128xf32>
    %cst_7 = arith.constant 0.000000e+00 : f32
    %9 = vector.broadcast %cst_7 : f32 to vector<8x128xf32>
    %10 = arith.maximumf %8, %9 : vector<8x128xf32>
    %11 = vector.extract_strided_slice %7 {offsets = [0, 128], sizes = [8, 128], strides = [1, 1]} : vector<8x256xf32> to vector<8x128xf32>
    %cst_8 = arith.constant 0.000000e+00 : f32
    %12 = vector.broadcast %cst_8 : f32 to vector<8x128xf32>
    %13 = arith.subf %12, %11 : vector<8x128xf32>
    %14 = math.exp %13 : vector<8x128xf32>
    %cst_9 = arith.constant 1.000000e+00 : f32
    %15 = vector.broadcast %cst_9 : f32 to vector<8x128xf32>
    %16 = arith.addf %15, %14 : vector<8x128xf32>
    %17 = tpu.reciprocal %16 {approx = true} : vector<8x128xf32> -> vector<8x128xf32>
    %18 = arith.subf %10, %0 : vector<8x128xf32>
    %19 = arith.mulf %17, %18 : vector<8x128xf32>
    %20 = arith.addf %0, %19 : vector<8x128xf32>
    %c1 = arith.constant 1 : index
    %c0_10 = arith.constant 0 : index
    %c0_11 = arith.constant 0 : index
    %21 = vector.load %arg2[%c1, %c0_10, %c0_11] : memref<2x128x256xf32, #tpu.memory_space<vmem>>, vector<1x128x256xf32>
    %22 = vector.shape_cast %21 : vector<1x128x256xf32> to vector<128x256xf32>
    %cst_12 = arith.constant dense<0.000000e+00> : vector<8x256xf32>
    %23 = tpu.matmul %20, %22, %cst_12 {dimension_numbers = #tpu.dot_dimension_numbers<[1], [0], [0], [1], [0, 0, 1, 1], [], []>} : vector<8x128xf32>, vector<128x256xf32>, vector<8x256xf32> -> vector<8x256xf32>
    %c1_13 = arith.constant 1 : index
    %c0_14 = arith.constant 0 : index
    %c0_15 = arith.constant 0 : index
    %24 = vector.load %arg3[%c1_13, %c0_14, %c0_15] : memref<2x1x256xf32, #tpu.memory_space<vmem>>, vector<1x1x256xf32>
    %25 = vector.shape_cast %24 : vector<1x1x256xf32> to vector<1x256xf32>
    %26 = vector.broadcast %25 : vector<1x256xf32> to vector<8x256xf32>
    %27 = arith.addf %23, %26 : vector<8x256xf32>
    %28 = vector.extract_strided_slice %27 {offsets = [0, 0], sizes = [8, 128], strides = [1, 1]} : vector<8x256xf32> to vector<8x128xf32>
    %cst_16 = arith.constant 0.000000e+00 : f32
    %29 = vector.broadcast %cst_16 : f32 to vector<8x128xf32>
    %30 = arith.maximumf %28, %29 : vector<8x128xf32>
    %31 = vector.extract_strided_slice %27 {offsets = [0, 128], sizes = [8, 128], strides = [1, 1]} : vector<8x256xf32> to vector<8x128xf32>
    %cst_17 = arith.constant 0.000000e+00 : f32
    %32 = vector.broadcast %cst_17 : f32 to vector<8x128xf32>
    %33 = arith.subf %32, %31 : vector<8x128xf32>
    %34 = math.exp %33 : vector<8x128xf32>
    %cst_18 = arith.constant 1.000000e+00 : f32
    %35 = vector.broadcast %cst_18 : f32 to vector<8x128xf32>
    %36 = arith.addf %35, %34 : vector<8x128xf32>
    %37 = tpu.reciprocal %36 {approx = true} : vector<8x128xf32> -> vector<8x128xf32>
    %38 = arith.subf %30, %20 : vector<8x128xf32>
    %39 = arith.mulf %37, %38 : vector<8x128xf32>
    %40 = arith.addf %20, %39 : vector<8x128xf32>
    %c0_19 = arith.constant 0 : index
    %c0_20 = arith.constant 0 : index
    %41 = vector.load %arg4[%c0_19, %c0_20] : memref<8x128xf32, #tpu.memory_space<vmem>>, vector<8x128xf32>
    tpu.vector_store %arg4[%c0_19, %c0_20], %40 {strides = array<i32>} : memref<8x128xf32, #tpu.memory_space<vmem>>, vector<8x128xf32>,
    return
  }
  func.func @transform_0(%arg0: i32) -> (i32, i32) {
    %c0_i32 = arith.constant 0 : i32
    %c0_i32_0 = arith.constant 0 : i32
    return %arg0, %c0_i32 : i32, i32
  }
  func.func @transform_1(%arg0: i32) -> (i32, i32, i32) {
    %c0_i32 = arith.constant 0 : i32
    %c0_i32_0 = arith.constant 0 : i32
    %c0_i32_1 = arith.constant 0 : i32
    %c0_i32_2 = arith.constant 0 : i32
    return %c0_i32, %c0_i32_0, %c0_i32_1 : i32, i32, i32
  }
  func.func @transform_2(%arg0: i32) -> (i32, i32, i32) {
    %c0_i32 = arith.constant 0 : i32
    %c0_i32_0 = arith.constant 0 : i32
    %c0_i32_1 = arith.constant 0 : i32
    %c0_i32_2 = arith.constant 0 : i32
    return %c0_i32, %c0_i32_0, %c0_i32_1 : i32, i32, i32
  }
  func.func @transform_3(%arg0: i32) -> (i32, i32) {
    %c0_i32 = arith.constant 0 : i32
    %c0_i32_0 = arith.constant 0 : i32
    return %arg0, %c0_i32 : i32, i32
  }
}

</mosaic_0001>

<bundles_post_ra>
// kernel: tpu_custom_call.1
= control target key start
LH: loop header
LB: loop body
LE: loop exit
PB: predicated region body
PF: predicated region fallthrough
CT: control target
= control target key end

     0   :  { %8 = vsyncpa [#allocation3], 0  ;;  %s420_s0 = inlined_call_operand.hbm [shape: f32[8,128], index: 0, kind: input, shape index: {}]   ;;  %s421_s1 = inlined_call_operand.hbm [shape: f32[2,128,256], index: 1, kind: input, shape index: {}]   ;;  %s422_s2 = inlined_call_operand.hbm [shape: f32[2,1,256], index: 2, kind: input, shape index: {}]   ;;  %s423_s3 = inlined_call_operand.hbm [shape: f32[8,128], index: 3, kind: output, shape index: {}]  }
   0x1   :  { %9 = vsyncpa [#allocation6], 0  ;;  %s26_s14 = sshll.u32 %s421_s1, 4  ;;  %s27_s14 = int_to_ptr.hbm [resolvable:$true] %s26_s14 }
   0x2   :  { %10 = vsyncpa [#allocation4], 0  ;;  %s374_s15 = smov [#allocation5]   ;;  %s16_s19 = sshll.u32 %s420_s0, 4  ;;  %s17_s19 = int_to_ptr.hbm [resolvable:$true] %s16_s19 }
   0x3   :  { %s28_s16 = sshll.u32 %s374_s15, 4  ;;  %s375_s20 = smov 256   ;;  %s29_s16 = int_to_ptr.vmem [resolvable:$true] %s28_s16 }
   0x4   :  { %s376_s21 = smov 16   ;;  %s377_s22 = smov [#allocation2]  }
   0x5   :  { %34 = dma.hbm_to_vmem [thread:$0]  %s27_s14, 8192, %s29_s16, [#allocation6], %s375_s20, %s375_s20, %s376_s21  }
   0x6   :  { %s18_s23 = sshll.u32 %s377_s22, 4  ;;  %s39_s26 = sshll.u32 %s422_s2, 4  ;;  %s19_s23 = int_to_ptr.vmem [resolvable:$true] %s18_s23  ;;  %s40_s26 = int_to_ptr.hbm [resolvable:$true] %s39_s26 }
   0x7   :  { %21 = dma.hbm_to_vmem [thread:$0]  %s17_s19, 128, %s19_s23, [#allocation3]  }
   0x8   :  { %s378_s1 = smov [#allocation7]   ;;  %s379_s28 = smov 32  }
   0x9   :  { %s41_s27 = sshll.u32 %s378_s1, 4  ;;  %s380_s29 = smov 2   ;;  %s42_s27 = int_to_ptr.vmem [resolvable:$true] %s41_s27 }
   0xa   :  { %47 = dma.hbm_to_vmem [thread:$0]  %s40_s26, 64, %s42_s27, [#allocation6], %s379_s28, %s379_s28, %s380_s29  }
   0xb   :  { %368 = dma.done.wait [#allocation3], 128  }
   0xc   :  { %369 = vsyncadd [#allocation3], 4294967168 }
   0xd   :  { %370 = dma.done.wait [#allocation6], 8256  }
   0xe   :  { %371 = vsyncadd [#allocation6], 4294959040  ;;  %v92_v0 = vld [vmem:[#allocation5 + $0xf8] sm:$0xff]  ;;  %v90_v1 = vld [vmem:[#allocation5 + $0xe8] sm:$0xff]  ;;  %s381_s0 = smov [#allocation8]   ;;  %s245_s5 = sshll.u32 %s423_s3, 4  ;;  %s246_s5 = int_to_ptr.hbm [resolvable:$true] %s245_s5 }
   0xf   :  { %119 = vmatpush.msra.mxu1 %v92_v0  ;;  %v88_v2 = vld [vmem:[#allocation5 + $0xd8] sm:$0xff]  ;;  %v91_v3 = vld [vmem:[#allocation5 + $0xf0] sm:$0xff]  ;;  %v89_v4 = vld [vmem:[#allocation5 + $0xe0] sm:$0xff]  ;;  %s243_s2 = sshll.u32 %s381_s0, 4  ;;  %s244_s2 = int_to_ptr.vmem [resolvable:$true] %s243_s2 }
  0x10   :  { %99 = vmatpush.msra.mxu0 %v91_v3  ;;  %v86_v5 = vld [vmem:[#allocation5 + $0xc8] sm:$0xff]  ;;  %v87_v6 = vld [vmem:[#allocation5 + $0xd0] sm:$0xff]  ;;  %v84_v7 = vld [vmem:[#allocation5 + $0xb8] sm:$0xff] }
  0x11   :  { %120 = vmatpush.msra.mxu1 %v90_v1  ;;  %v85_v8 = vld [vmem:[#allocation5 + $0xc0] sm:$0xff]  ;;  %v82_v9 = vld [vmem:[#allocation5 + $0xa8] sm:$0xff]  ;;  %v83_v10 = vld [vmem:[#allocation5 + $0xb0] sm:$0xff] }
  0x12   :  { %100 = vmatpush.msra.mxu0 %v89_v4  ;;  %v80_v11 = vld [vmem:[#allocation5 + $0x98] sm:$0xff]  ;;  %v81_v12 = vld [vmem:[#allocation5 + $0xa0] sm:$0xff]  ;;  %v179_v13 = vld [vmem:[#allocation5 + $0x1f0] sm:$0xff] }
  0x13   :  { %121 = vmatpush.msra.mxu1 %v88_v2  ;;  %v180_v14 = vld [vmem:[#allocation5 + $0x1f8] sm:$0xff]  ;;  %v177_v15 = vld [vmem:[#allocation5 + $0x1e0] sm:$0xff]  ;;  %v78_v16 = vld [vmem:[#allocation5 + $0x88] sm:$0xff]  ;;  %188 = vmatpush.msra.mxu2 %v179_v13 }
  0x14   :  { %101 = vmatpush.msra.mxu0 %v87_v6  ;;  %v79_v17 = vld [vmem:[#allocation5 + $0x90] sm:$0xff]  ;;  %208 = vmatpush.msra.mxu3 %v180_v14  ;;  %v178_v18 = vld [vmem:[#allocation5 + $0x1e8] sm:$0xff]  ;;  %v76_v19 = vld [vmem:[#allocation5 + $0x78] sm:$0xff] }
  0x15   :  { %122 = vmatpush.msra.mxu1 %v86_v5  ;;  %v77_v20 = vld [vmem:[#allocation5 + $0x80] sm:$0xff]  ;;  %189 = vmatpush.msra.mxu2 %v177_v15  ;;  %v74_v21 = vld [vmem:[#allocation5 + $0x68] sm:$0xff]  ;;  %v75_v22 = vld [vmem:[#allocation5 + $0x70] sm:$0xff] }
  0x16   :  { %102 = vmatpush.msra.mxu0 %v85_v8  ;;  %209 = vmatpush.msra.mxu3 %v178_v18  ;;  %v72_v23 = vld [vmem:[#allocation5 + $0x58] sm:$0xff]  ;;  %v73_v24 = vld [vmem:[#allocation5 + $0x60] sm:$0xff]  ;;  %v70_v25 = vld [vmem:[#allocation5 + $0x48] sm:$0xff] }
  0x17   :  { %123 = vmatpush.msra.mxu1 %v84_v7  ;;  %v71_v26 = vld [vmem:[#allocation5 + $0x50] sm:$0xff]  ;;  %v68_v27 = vld [vmem:[#allocation5 + $0x38] sm:$0xff]  ;;  %v69_v28 = vld [vmem:[#allocation5 + $0x40] sm:$0xff] }
  0x18   :  { %103 = vmatpush.msra.mxu0 %v83_v10  ;;  %v66_v29 = vld [vmem:[#allocation5 + $0x28] sm:$0xff]  ;;  %v67_v30 = vld [vmem:[#allocation5 + $0x30] sm:$0xff]  ;;  %v64_v31 = vld [vmem:[#allocation5 + $0x18] sm:$0xff] }
  0x19   :  { %124 = vmatpush.msra.mxu1 %v82_v9  ;;  %v65_v32 = vld [vmem:[#allocation5 + $0x20] sm:$0xff]  ;;  %v62_v33 = vld [vmem:[#allocation5 + $0x8] sm:$0xff]  ;;  %v63_v34 = vld [vmem:[#allocation5 + $0x10] sm:$0xff] }
  0x1a   :  { %104 = vmatpush.msra.mxu0 %v81_v12  ;;  %v411_v35 = vld [vmem:[#allocation2] sm:$0xff]  ;;  %v61_v36 = vld [vmem:[#allocation5] sm:$0xff]  ;;  %v175_v37 = vld [vmem:[#allocation5 + $0x1d0] sm:$0xff] }
  0x1b   :  { %125 = vmatpush.msra.mxu1 %v80_v11  ;;  %v176_v38 = vld [vmem:[#allocation5 + $0x1d8] sm:$0xff]  ;;  %190 = vmatpush.msra.mxu2 %v175_v37  ;;  %v173_v39 = vld [vmem:[#allocation5 + $0x1c0] sm:$0xff]  ;;  %v174_v40 = vld [vmem:[#allocation5 + $0x1c8] sm:$0xff] }
  0x1c   :  { %105 = vmatpush.msra.mxu0 %v79_v17  ;;  %210 = vmatpush.msra.mxu3 %v176_v38  ;;  %v171_v41 = vld [vmem:[#allocation5 + $0x1b0] sm:$0xff]  ;;  %v172_v42 = vld [vmem:[#allocation5 + $0x1b8] sm:$0xff]  ;;  %v169_v43 = vld [vmem:[#allocation5 + $0x1a0] sm:$0xff] }
  0x1d   :  { %126 = vmatpush.msra.mxu1 %v78_v16  ;;  %191 = vmatpush.msra.mxu2 %v173_v39  ;;  %v170_v44 = vld [vmem:[#allocation5 + $0x1a8] sm:$0xff]  ;;  %v167_v45 = vld [vmem:[#allocation5 + $0x190] sm:$0xff]  ;;  %v168_v46 = vld [vmem:[#allocation5 + $0x198] sm:$0xff] }
  0x1e   :  { %106 = vmatpush.msra.mxu0 %v77_v20  ;;  %211 = vmatpush.msra.mxu3 %v174_v40  ;;  %v165_v47 = vld [vmem:[#allocation5 + $0x180] sm:$0xff]  ;;  %v166_v48 = vld [vmem:[#allocation5 + $0x188] sm:$0xff]  ;;  %v163_v49 = vld [vmem:[#allocation5 + $0x170] sm:$0xff] }
  0x1f   :  { %127 = vmatpush.msra.mxu1 %v76_v19  ;;  %192 = vmatpush.msra.mxu2 %v171_v41  ;;  %v164_v50 = vld [vmem:[#allocation5 + $0x178] sm:$0xff]  ;;  %v161_v51 = vld [vmem:[#allocation5 + $0x160] sm:$0xff]  ;;  %v162_v52 = vld [vmem:[#allocation5 + $0x168] sm:$0xff] }
  0x20   :  { %107 = vmatpush.msra.mxu0 %v75_v22  ;;  %212 = vmatpush.msra.mxu3 %v172_v42  ;;  %v159_v53 = vld [vmem:[#allocation5 + $0x150] sm:$0xff]  ;;  %v160_v54 = vld [vmem:[#allocation5 + $0x158] sm:$0xff]  ;;  %v157_v55 = vld [vmem:[#allocation5 + $0x140] sm:$0xff] }
  0x21   :  { %128 = vmatpush.msra.mxu1 %v74_v21  ;;  %193 = vmatpush.msra.mxu2 %v169_v43  ;;  %v158_v56 = vld [vmem:[#allocation5 + $0x148] sm:$0xff]  ;;  %v155_v57 = vld [vmem:[#allocation5 + $0x130] sm:$0xff]  ;;  %v156_v58 = vld [vmem:[#allocation5 + $0x138] sm:$0xff] }
  0x22   :  { %108 = vmatpush.msra.mxu0 %v73_v24  ;;  %213 = vmatpush.msra.mxu3 %v170_v44  ;;  %v153_v59 = vld [vmem:[#allocation5 + $0x120] sm:$0xff]  ;;  %v154_v60 = vld [vmem:[#allocation5 + $0x128] sm:$0xff]  ;;  %v151_v61 = vld [vmem:[#allocation5 + $0x110] sm:$0xff] }
  0x23   :  { %129 = vmatpush.msra.mxu1 %v72_v23  ;;  %194 = vmatpush.msra.mxu2 %v167_v45  ;;  %v152_v62 = vld [vmem:[#allocation5 + $0x118] sm:$0xff]  ;;  %v149_v63 = vld [vmem:[#allocation5 + $0x100] sm:$0xff]  ;;  %v150_v0 = vld [vmem:[#allocation5 + $0x108] sm:$0xff] }
  0x24   :  { %109 = vmatpush.msra.mxu0 %v71_v26  ;;  %214 = vmatpush.msra.mxu3 %v168_v46  ;;  %v93_v1 = vld [vmem:[#allocation7] sm:$0x3]  ;;  %v182_v17 = vld [vmem:[#allocation7 + $0x2] sm:$0x3] }
  0x25   :  { %130 = vmatpush.msra.mxu1 %v70_v25  ;;  %195 = vmatpush.msra.mxu2 %v165_v47  ;;  %v96_v2 = vperm.slane %v93_v1, 1  ;;  %v95_v7 = vperm.slane %v93_v1, 0  ;;  %v185_v18 = vperm.slane %v182_v17, 1  ;;  %v184_v23 = vperm.slane %v182_v17, 0 }
  0x26   :  { %110 = vmatpush.msra.mxu0 %v69_v28  ;;  %215 = vmatpush.msra.mxu3 %v166_v48 }
  0x27   :  { %131 = vmatpush.msra.mxu1 %v68_v27  ;;  %196 = vmatpush.msra.mxu2 %v163_v49 }
  0x28   :  { %111 = vmatpush.msra.mxu0 %v67_v30  ;;  %216 = vmatpush.msra.mxu3 %v164_v50 }
  0x29   :  { %132 = vmatpush.msra.mxu1 %v66_v29  ;;  %197 = vmatpush.msra.mxu2 %v161_v51 }
  0x2a   :  { %112 = vmatpush.msra.mxu0 %v65_v32  ;;  %217 = vmatpush.msra.mxu3 %v162_v52 }
  0x2b   :  { %133 = vmatpush.msra.mxu1 %v64_v31  ;;  %198 = vmatpush.msra.mxu2 %v159_v53 }
  0x2c   :  { %113 = vmatpush.msra.mxu0 %v63_v34  ;;  %218 = vmatpush.msra.mxu3 %v160_v54 }
  0x2d   :  { %134 = vmatpush.msra.mxu1 %v62_v33  ;;  %199 = vmatpush.msra.mxu2 %v157_v55 }
  0x2e   :  { %135 = vmatmul.f32.vlgmr.msra.gmra.mxu1 %v411_v35  ;;  %114 = vmatpush.msra.mxu0 %v61_v36 }
  0x2f   :  { %115 = vmatmul.f32.vlgmr.msra.gmra.mxu0 %v411_v35  ;;  %219 = vmatpush.msra.mxu3 %v158_v56 }
  0x30   :  { %200 = vmatpush.msra.mxu2 %v155_v57 }
  0x31   :  { %220 = vmatpush.msra.mxu3 %v156_v58 }
  0x32   :  { %201 = vmatpush.msra.mxu2 %v153_v59 }
  0x33   :  { %221 = vmatpush.msra.mxu3 %v154_v60 }
  0x34   :  { %202 = vmatpush.msra.mxu2 %v151_v61 }
  0x35   :  { %222 = vmatpush.msra.mxu3 %v152_v62 }
  0x36   :  { %203 = vmatpush.msra.mxu2 %v149_v63 }
  0x37   :  { %223 = vmatpush.msra.mxu3 %v150_v0 }
  0xab   :  { %v136_v3 = vpop.f32.mrf.mxu1 }
  0xac   :  { %v137_v4 = vadd.f32 %v136_v3, %v96_v2  ;;  %v116_v8 = vpop.f32.mrf.mxu0 }
  0xad   :  { %v117_v9 = vadd.f32 %v116_v8, %v95_v7 }
  0xae   :  { %v140_v5 = vsub.f32 0.0, %v137_v4 }
  0xaf   :  { %v139_v12 = vmax.f32 %v117_v9, 0.0 }
  0xb0   :  { %v141_v6 = vmul.f32 1.442695, %v140_v5 }
  0xb1   :  { %v145_v13 = vsub.f32 %v139_v12, %v411_v35 }
  0xb2   :  { %264 = vpow2.f32 %v141_v6 }
  0xb8   :  { %v265_v10 = vpop.eup %264 }
  0xb9   :  { %v143_v11 = vadd.f32 1.0, %v265_v10 }
  0xbb   :  { %266 = vrcp.f32 %v143_v11 }
  0xc1   :  { %v267_v14 = vpop.eup %266 }
  0xc2   :  { %v146_v15 = vmul.f32 %v267_v14, %v145_v13 }
  0xc4   :  { %v147_v16 = vadd.f32 %v146_v15, %v411_v35 }
  0xc6   :  { %204 = vmatmul.f32.vlgmr.msra.gmra.mxu2 %v147_v16  ;;  %224 = vmatmul.f32.vlgmr.msra.gmra.mxu3 %v147_v16 }
 0x149   :  { %v225_v19 = vpop.f32.mrf.mxu3  ;;  %v205_v24 = vpop.f32.mrf.mxu2 }
 0x14a   :  { %v226_v20 = vadd.f32 %v225_v19, %v185_v18  ;;  %v206_v26 = vadd.f32 %v205_v24, %v184_v23 }
 0x14c   :  { %v229_v21 = vsub.f32 0.0, %v226_v20  ;;  %v228_v28 = vmax.f32 %v206_v26, 0.0 }
 0x14e   :  { %v230_v22 = vmul.f32 1.442695, %v229_v21  ;;  %v234_v29 = vsub.f32 %v228_v28, %v147_v16 }
 0x150   :  { %268 = vpow2.f32 %v230_v22 }
 0x156   :  { %v269_v25 = vpop.eup %268 }
 0x157   :  { %v232_v27 = vadd.f32 1.0, %v269_v25 }
 0x159   :  { %270 = vrcp.f32 %v232_v27 }
 0x15f   :  { %v271_v30 = vpop.eup %270 }
 0x160   :  { %v235_v31 = vmul.f32 %v271_v30, %v234_v29 }
 0x162   :  { %v236_v32 = vadd.f32 %v235_v31, %v147_v16 }
 0x164   :  { %237 = vst [vmem:[#allocation8] sm:$0xff] %v236_v32 }
 0x165   :  { %248 = dma.vmem_to_hbm [thread:$0]  %s244_s2, 128, %s246_s5, [#allocation4]  }
 0x166   :  { %372 = dma.done.wait [#allocation4], 128  }
 0x167   :  { %373 = vsyncadd [#allocation4], 4294967168 }
 0x168   :  { %253 = vsyncpa [#allocation3], 1 }
 0x169   :  { %254 = vsyncpa [#allocation6], 1 }
 0x16a   :  { %255 = vsyncpa [#allocation4], 1 }

</bundles_post_ra>
